<compile_context>
chip_gen: v5e
topology: v5e:2x2
jax: 0.10.0
libtpu: 0.0.40
codegen_flags: <defaults>
</compile_context>

<pallas_src>
import functools

import jax
import jax.numpy as jnp
from jax.experimental import pallas as pl
from jax.experimental.pallas import tpu as pltpu


def _temporal_mean_kernel(x_ref, o_ref, acc_ref, *, t_total, t_chunk, needs_t_mask):
    """Accumulate f32 row-sums of one (R, t_chunk, D) slab; finalize on last chunk."""
    k = pl.program_id(1)

    @pl.when(k == 0)
    def _():
        acc_ref[...] = jnp.zeros_like(acc_ref)

    xb = x_ref[...]                                           # (R, t_chunk, D)
    if needs_t_mask:
        # Ragged last T-chunk: zero out-of-range timesteps before summing so
        # stale VMEM past the array boundary never contaminates the mean.
        t_idx = k * t_chunk + jax.lax.broadcasted_iota(jnp.int32, xb.shape, 1)
        xb = jnp.where(t_idx < t_total, xb, jnp.zeros_like(xb))

    acc_ref[...] += jnp.sum(xb, axis=1, dtype=jnp.float32)    # (R, D) f32

    @pl.when(k == pl.num_programs(1) - 1)
    def _():
        o_ref[...] = (acc_ref[...] * (1.0 / t_total)).astype(o_ref.dtype)


def temporal_mean_pallas(x, *, vmem_budget_bytes=None):
    """Mean over dim=2 of a (B, C, T, D) array, computed in a Pallas kernel."""
    B, C, T, D = x.shape
    rows = B * C
    xf = x.reshape(rows, T, D)

    in_itemsize = jnp.dtype(x.dtype).itemsize
    out_itemsize = in_itemsize
    # sublane multiple for packed dtypes (f32 -> 8, bf16 -> 16, int8/fp8 -> 32)
    sublane = max(8, 32 // max(in_itemsize, 1))

    # --- Generation-aware VMEM budget / scoped limit -------------------------
    try:
        info = pltpu.get_tpu_info()
        vmem_cap = int(getattr(info, "vmem_capacity_bytes", 64 * 1024 * 1024))
    except Exception:  # pragma: no cover - conservative fallback
        vmem_cap = 64 * 1024 * 1024
    if vmem_budget_bytes is None:
        if vmem_cap >= 100 * 1024 * 1024:      # v5e / v6e: 128 MiB physical
            vmem_budget_bytes = 40 * 1024 * 1024
        else:                                  # v7x: 64 MiB per TensorCore
            vmem_budget_bytes = 16 * 1024 * 1024
    vmem_limit_bytes = int(min(vmem_cap - 8 * 1024 * 1024,
                               vmem_budget_bytes + 24 * 1024 * 1024))

    # --- Tile selection -------------------------------------------------------
    # Per-row VMEM cost: double-buffered input slab + output block (counted
    # double-buffered to be safe) + the resident f32 accumulator scratch.
    def per_row_bytes(t_chunk):
        return (2 * t_chunk * D * in_itemsize
                + 2 * D * out_itemsize
                + D * 4)

    t_chunk = T
    r_budget = (vmem_budget_bytes // per_row_bytes(T)) // sublane * sublane
    if r_budget >= sublane:
        # Full-T slabs fit: size R by the budget, but keep >= 4 grid steps
        # along rows when the row count allows it so each v7x TensorCore gets
        # >= 2 pipelined steps (DMA overlaps the previous step's reduce).
        r_cap = max(sublane, pl.cdiv(pl.cdiv(rows, 4), sublane) * sublane)
        R = max(sublane, min(r_budget, r_cap))
    else:
        # Even `sublane` rows at full T blow the budget: chunk the T axis.
        R = sublane
        fixed = R * (2 * D * out_itemsize + D * 4)
        t_chunk = (vmem_budget_bytes - fixed) // (2 * R * D * in_itemsize)
        t_chunk = max(8, (t_chunk // 8) * 8)   # second-to-last block dim: 8-aligned
        t_chunk = min(t_chunk, T)

    num_row_blocks = pl.cdiv(rows, R)
    num_t_blocks = pl.cdiv(T, t_chunk)
    needs_t_mask = (num_t_blocks > 1) and (T % t_chunk != 0)

    kernel = functools.partial(
        _temporal_mean_kernel,
        t_total=T, t_chunk=t_chunk, needs_t_mask=needs_t_mask,
    )

    out = pl.pallas_call(
        kernel,
        out_shape=jax.ShapeDtypeStruct((rows, D), x.dtype),
        grid_spec=pltpu.PrefetchScalarGridSpec(
            num_scalar_prefetch=0,
            grid=(num_row_blocks, num_t_blocks),
            in_specs=[pl.BlockSpec((R, t_chunk, D), lambda i, k: (i, k, 0))],
            out_specs=pl.BlockSpec((R, D), lambda i, k: (i, 0)),
            scratch_shapes=[pltpu.VMEM((R, D), jnp.float32)],
        ),
        compiler_params=pltpu.CompilerParams(
            dimension_semantics=("parallel", "arbitrary"),
            vmem_limit_bytes=vmem_limit_bytes,
        ),
        cost_estimate=pl.CostEstimate(
            flops=rows * T * D,
            bytes_accessed=rows * T * D * in_itemsize + rows * D * out_itemsize,
            transcendentals=0,
        ),
    )(xf)
    return out.reshape(B, C, D)


class Lambda:
    """JAX/Pallas equivalent of the PyTorch Lambda module: applies `func` to x."""

    def __init__(self, func):
        self.func = func

    def __call__(self, x):
        return self.func(x)


if __name__ == "__main__":
    key = jax.random.PRNGKey(0)

    # Lambda wrapping the temporal-mean func (hot path runs in the Pallas kernel).
    layer = Lambda(temporal_mean_pallas)

    # Case 1: evenly dividing shapes (D lane-aligned).
    B, C, T, D = 2, 4, 8, 128
    x = jax.random.normal(key, (B, C, T, D), dtype=jnp.float32)
    y = jax.block_until_ready(layer(x))
    ref = jnp.mean(x, axis=2)
    assert y.shape == (B, C, D), y.shape
    assert jnp.allclose(y, ref, atol=1e-5, rtol=1e-5), "mismatch vs reference (even)"

    # Case 2: ragged row count (rows=6 < sublane block of 8) exercises the
    # no-pad boundary-masked path that replaced the jnp.pad fallback.
    B2, C2, T2, D2 = 2, 3, 8, 128
    x2 = jax.random.normal(jax.random.PRNGKey(1), (B2, C2, T2, D2), dtype=jnp.float32)
    y2 = jax.block_until_ready(layer(x2))
    ref2 = jnp.mean(x2, axis=2)
    assert y2.shape == (B2, C2, D2), y2.shape
    assert jnp.allclose(y2, ref2, atol=1e-5, rtol=1e-5), "mismatch vs reference (ragged)"

    print("KERNEL_OK")
</pallas_src>

<mosaic_0001>
module attributes {stable_mosaic.version = 11 : i64} {
  func.func @_temporal_mean_kernel(%arg0: i32, %arg1: i32, %arg2: memref<8x8x128xf32, #tpu.memory_space<vmem>>, %arg3: memref<8x128xf32, #tpu.memory_space<vmem>>, %arg4: memref<8x128xf32, #tpu.memory_space<vmem>>) attributes {dimension_semantics = [#tpu.dimension_semantics<parallel>, #tpu.dimension_semantics<arbitrary>], iteration_bounds = array<i64: 1, 1>, scalar_prefetch = 0 : i64, scratch_operands = 1 : i64, tpu.core_type = #tpu.core_type<tc>, window_params = [{transform_indices = @transform_0, window_bounds = array<i64: 8, 8, 128>}, {transform_indices = @transform_1, window_bounds = array<i64: 8, 128>}]} {
    %c0_i32 = arith.constant 0 : i32
    %0 = arith.cmpi eq, %arg1, %c0_i32 : i32
    %1 = arith.extui %0 : i1 to i32
    %c0_i32_0 = arith.constant 0 : i32
    %2 = arith.cmpi ne, %1, %c0_i32_0 : i32
    scf.if %2 {
      %cst_9 = arith.constant 0.000000e+00 : f32
      %11 = vector.broadcast %cst_9 : f32 to vector<8x128xf32>
      %c0_10 = arith.constant 0 : index
      %c0_11 = arith.constant 0 : index
      %12 = vector.load %arg4[%c0_10, %c0_11] : memref<8x128xf32, #tpu.memory_space<vmem>>, vector<8x128xf32>
      tpu.vector_store %arg4[%c0_10, %c0_11], %11 {strides = array<i32>} : memref<8x128xf32, #tpu.memory_space<vmem>>, vector<8x128xf32>,
    } else {
    }
    %c0 = arith.constant 0 : index
    %c0_1 = arith.constant 0 : index
    %c0_2 = arith.constant 0 : index
    %3 = vector.load %arg2[%c0, %c0_1, %c0_2] : memref<8x8x128xf32, #tpu.memory_space<vmem>>, vector<8x8x128xf32>
    %c0_3 = arith.constant 0 : index
    %c0_4 = arith.constant 0 : index
    %4 = vector.load %arg4[%c0_3, %c0_4] : memref<8x128xf32, #tpu.memory_space<vmem>>, vector<8x128xf32>
    %cst = arith.constant dense<0.000000e+00> : vector<8x128xf32>
    %5 = vector.multi_reduction <add>, %3, %cst [1] : vector<8x8x128xf32> to vector<8x128xf32>
    %6 = arith.addf %4, %5 : vector<8x128xf32>
    %c0_5 = arith.constant 0 : index
    %c0_6 = arith.constant 0 : index
    %7 = vector.load %arg4[%c0_5, %c0_6] : memref<8x128xf32, #tpu.memory_space<vmem>>, vector<8x128xf32>
    tpu.vector_store %arg4[%c0_5, %c0_6], %6 {strides = array<i32>} : memref<8x128xf32, #tpu.memory_space<vmem>>, vector<8x128xf32>,
    %c0_i32_7 = arith.constant 0 : i32
    %8 = arith.cmpi eq, %arg1, %c0_i32_7 : i32
    %9 = arith.extui %8 : i1 to i32
    %c0_i32_8 = arith.constant 0 : i32
    %10 = arith.cmpi ne, %9, %c0_i32_8 : i32
    scf.if %10 {
      %c0_9 = arith.constant 0 : index
      %c0_10 = arith.constant 0 : index
      %11 = vector.load %arg4[%c0_9, %c0_10] : memref<8x128xf32, #tpu.memory_space<vmem>>, vector<8x128xf32>
      %cst_11 = arith.constant 1.250000e-01 : f32
      %12 = vector.broadcast %cst_11 : f32 to vector<8x128xf32>
      %13 = arith.mulf %11, %12 : vector<8x128xf32>
      %c0_12 = arith.constant 0 : index
      %c0_13 = arith.constant 0 : index
      %14 = vector.load %arg3[%c0_12, %c0_13] : memref<8x128xf32, #tpu.memory_space<vmem>>, vector<8x128xf32>
      tpu.vector_store %arg3[%c0_12, %c0_13], %13 {strides = array<i32>} : memref<8x128xf32, #tpu.memory_space<vmem>>, vector<8x128xf32>,
    } else {
    }
    return
  }
  func.func @transform_0(%arg0: i32, %arg1: i32) -> (i32, i32, i32) {
    %c0_i32 = arith.constant 0 : i32
    %c0_i32_0 = arith.constant 0 : i32
    return %arg0, %arg1, %c0_i32 : i32, i32, i32
  }
  func.func @transform_1(%arg0: i32, %arg1: i32) -> (i32, i32) {
    %c0_i32 = arith.constant 0 : i32
    %c0_i32_0 = arith.constant 0 : i32
    return %arg0, %c0_i32 : i32, i32
  }
}

</mosaic_0001>

<bundles_post_ra>
// kernel: tpu_custom_call.1
= control target key start
LH: loop header
LB: loop body
LE: loop exit
PB: predicated region body
PF: predicated region fallthrough
CT: control target
= control target key end

     0   :  { %6 = vsyncpa [#allocation4], 0  ;;  %s213_s0 = inlined_call_operand.hbm [shape: f32[8,8,128], index: 0, kind: input, shape index: {}]   ;;  %s214_s1 = inlined_call_operand.hbm [shape: f32[8,128], index: 1, kind: output, shape index: {}]  }
   0x1   :  { %7 = vsyncpa [#allocation5], 0  ;;  %s12_s8 = sshll.u32 %s213_s0, 4  ;;  %s191_s9 = smov [#allocation3]   ;;  %s13_s8 = int_to_ptr.hbm [resolvable:$true] %s12_s8 }
   0x2   :  { %s14_s10 = sshll.u32 %s191_s9, 4  ;;  %s192_s11 = smov 128   ;;  %s15_s10 = int_to_ptr.vmem [resolvable:$true] %s14_s10 }
   0x3   :  { %s193_s12 = smov 8  }
   0x4   :  { %20 = dma.hbm_to_vmem [thread:$0]  %s13_s8, 1024, %s15_s10, [#allocation4], %s192_s11, %s192_s11, %s193_s12  }
   0x5   :  { %187 = dma.done.wait [#allocation4], 1024  }
   0x6   :  { %188 = vsyncadd [#allocation4], 4294966272  ;;  %v30_v0 = vld [vmem:[#allocation3] sm:$0xff]  ;;  %v31_v1 = vld [vmem:[#allocation3 + $0x8] sm:$0xff]  ;;  %vm95_vm0 = vcmask 1041409   ;;  %vm97_vm1 = vcmask 1042434  }
   0x7   :  { %v32_v2 = vld [vmem:[#allocation3 + $0x10] sm:$0xff]  ;;  %v33_v3 = vld [vmem:[#allocation3 + $0x18] sm:$0xff]  ;;  %v34_v4 = vld [vmem:[#allocation3 + $0x20] sm:$0xff]  ;;  %v39_v6 = vrot.slane %v30_v0, 4  ;;  %v45_v7 = vrot.slane %v31_v1, 4  ;;  %vm99_vm2 = vcmask 1043459  }
   0x8   :  { %v35_v5 = vld [vmem:[#allocation3 + $0x28] sm:$0xff]  ;;  %v51_v8 = vrot.slane %v32_v2, 4  ;;  %v36_v9 = vld [vmem:[#allocation3 + $0x30] sm:$0xff]  ;;  %v37_v10 = vld [vmem:[#allocation3 + $0x38] sm:$0xff]  ;;  %v57_v11 = vrot.slane %v33_v3, 4  ;;  %v63_v12 = vrot.slane %v34_v4, 4 }
   0x9   :  { %v69_v13 = vrot.slane %v35_v5, 4  ;;  %v40_v14 = vadd.f32 %v39_v6, %v30_v0  ;;  %v46_v15 = vadd.f32 %v45_v7, %v31_v1  ;;  %v75_v17 = vrot.slane %v36_v9, 4  ;;  %s194_s0 = smov [#allocation6]   ;;  %s125_s16 = sshll.u32 %s214_s1, 4  ;;  %s126_s16 = int_to_ptr.hbm [resolvable:$true] %s125_s16 }
   0xa   :  { %v52_v16 = vadd.f32 %v51_v8, %v32_v2  ;;  %v58_v18 = vadd.f32 %v57_v11, %v33_v3  ;;  %v64_v19 = vadd.f32 %v63_v12, %v34_v4  ;;  %v81_v21 = vrot.slane %v37_v10, 4  ;;  %s123_s13 = sshll.u32 %s194_s0, 4  ;;  %s124_s13 = int_to_ptr.vmem [resolvable:$true] %s123_s13 }
   0xb   :  { %v70_v20 = vadd.f32 %v69_v13, %v35_v5  ;;  %v41_v22 = vrot.slane %v40_v14, 2  ;;  %v47_v23 = vrot.slane %v46_v15, 2  ;;  %v76_v25 = vadd.f32 %v75_v17, %v36_v9 }
   0xc   :  { %v53_v24 = vrot.slane %v52_v16, 2  ;;  %v59_v26 = vrot.slane %v58_v18, 2  ;;  %v65_v27 = vrot.slane %v64_v19, 2  ;;  %v82_v29 = vadd.f32 %v81_v21, %v37_v10 }
   0xd   :  { %v71_v28 = vrot.slane %v70_v20, 2  ;;  %v42_v30 = vadd.f32 %v41_v22, %v40_v14  ;;  %v48_v31 = vadd.f32 %v47_v23, %v46_v15  ;;  %v77_v33 = vrot.slane %v76_v25, 2 }
   0xe   :  { %v54_v32 = vadd.f32 %v53_v24, %v52_v16  ;;  %v60_v34 = vadd.f32 %v59_v26, %v58_v18  ;;  %v66_v35 = vadd.f32 %v65_v27, %v64_v19  ;;  %v83_v37 = vrot.slane %v82_v29, 2 }
   0xf   :  { %v72_v36 = vadd.f32 %v71_v28, %v70_v20  ;;  %v43_v38 = vrot.slane %v42_v30, 1  ;;  %v49_v39 = vrot.slane %v48_v31, 1  ;;  %v78_v41 = vadd.f32 %v77_v33, %v76_v25 }
  0x10   :  { %v55_v40 = vrot.slane %v54_v32, 1  ;;  %v61_v42 = vrot.slane %v60_v34, 1  ;;  %v67_v43 = vrot.slane %v66_v35, 1  ;;  %v84_v45 = vadd.f32 %v83_v37, %v82_v29 }
  0x11   :  { %v73_v44 = vrot.slane %v72_v36, 1  ;;  %v44_v46 = vadd.f32 %v43_v38, %v42_v30  ;;  %v50_v47 = vadd.f32 %v49_v39, %v48_v31  ;;  %v79_v49 = vrot.slane %v78_v41, 1 }
  0x12   :  { %v56_v48 = vadd.f32 %v55_v40, %v54_v32  ;;  %v62_v50 = vadd.f32 %v61_v42, %v60_v34  ;;  %v68_v51 = vadd.f32 %v67_v43, %v66_v35  ;;  %v85_v52 = vrot.slane %v84_v45, 1 }
  0x13   :  { %v74_v53 = vadd.f32 %v73_v44, %v72_v36  ;;  %v96_v54 = vsel %vm95_vm0, %v50_v47, %v44_v46  ;;  %vm101_vm3 = vcmask 1044484   ;;  %v80_v55 = vadd.f32 %v79_v49, %v78_v41 }
  0x14   :  { %v98_v56 = vsel %vm97_vm1, %v56_v48, %v96_v54  ;;  %vm103_vm4 = vcmask 1045509   ;;  %v86_v57 = vadd.f32 %v85_v52, %v84_v45  ;;  %vm105_vm5 = vcmask 1046534  }
  0x15   :  { %v100_v58 = vsel %vm99_vm2, %v62_v50, %v98_v56  ;;  %vm107_vm6 = vcmask 1047559  }
  0x16   :  { %v102_v59 = vsel %vm101_vm3, %v68_v51, %v100_v58 }
  0x17   :  { %v104_v60 = vsel %vm103_vm4, %v74_v53, %v102_v59 }
  0x18   :  { %v106_v61 = vsel %vm105_vm5, %v80_v55, %v104_v60 }
  0x19   :  { %v108_v62 = vsel %vm107_vm6, %v86_v57, %v106_v61 }
  0x1a   :  { %v116_v63 = vmul.f32 0.125, %v108_v62 }
  0x1c   :  { %117 = vst [vmem:[#allocation6] sm:$0xff] %v116_v63 }
  0x1d   :  { %128 = dma.vmem_to_hbm [thread:$0]  %s124_s13, 128, %s126_s16, [#allocation5]  }
  0x1e   :  { %189 = dma.done.wait [#allocation5], 128  }
  0x1f   :  { %190 = vsyncadd [#allocation5], 4294967168 }
  0x20   :  { %133 = vsyncpa [#allocation4], 1 }
  0x21   :  { %134 = vsyncpa [#allocation5], 1 }

</bundles_post_ra>
